<compile_context>
chip_gen: v7x
topology: tpu7x:2x2x1
jax: 0.10.0
libtpu: 0.0.40
codegen_flags: <defaults>
</compile_context>

<pallas_src>
import functools

import jax
import jax.numpy as jnp
from jax.experimental import pallas as pl
from jax.experimental.pallas import tpu as pltpu

_VMEM_LIMIT = 32 * 1024 * 1024     # explicit scoped-VMEM cap (fits v5e/v6e/v7x)
_NEG_BIG = -1e30                   # finite "minus infinity" for masking


def _round_up(x, m):
    return (x + m - 1) // m * m


# ------------------------------ projection kernel ----------------------------

def _proj_kernel(xt_ref, wlt_ref, wr_ref, glt_ref, gr_ref, *, apply_elu):
    """Fused per-head projections for one 128-node column tile of x^T.

    Input is only x^T ([F, TI]); x is recovered with one tiny in-kernel
    transpose (no duplicated HBM reads, ELU applied exactly once).
      g_l^T = W_l_packed^T @ x^T  ->  [H*D, TI]  (nodes on the lane axis)
      g_r   = x @ W_r_packed      ->  [TI, H*D]  (nodes on the sublane axis)
    The optional ELU (GAT.activation between the two layers) is fused here.
    """
    xt = xt_ref[...]                                      # [F, TI]
    if apply_elu:
        xt = jnp.where(xt > 0.0, xt, jnp.exp(xt) - 1.0)
    glt_ref[...] = jnp.dot(wlt_ref[...], xt, preferred_element_type=jnp.float32)
    x = xt.T                                              # [TI, F] (tiny transpose)
    gr_ref[...] = jnp.dot(x, wr_ref[...], preferred_element_type=jnp.float32)


# --------------------------- attention / aggregation -------------------------

def _attn_kernel(glt_ref, gri_ref, grj_ref, adj_ref, attn_ref,
                 out_ref, m_ref, l_ref, acc_ref, *,
                 n_heads, head_dim, is_concat, negative_slope, tile_c):
    """One (query tile i, big source block j) grid step.

    The online softmax over sources is streamed twice: across j grid blocks via
    the head-folded scratch buffers, and inside the kernel over tile_c chunks of
    the current j block (keeps the live score tile at [TI, tile_c]).
    """
    jblk = pl.program_id(1)
    tile_j = adj_ref.shape[1]
    n_chunks = tile_j // tile_c

    # LeakyReLU(u) = c1*u + c2*|u|   (exact for slope in [0, 1])
    c1 = 0.5 * (1.0 + negative_slope)
    c2 = 0.5 * (1.0 - negative_slope)

    @pl.when(jblk == 0)
    def _init():
        m_ref[...] = jnp.full(m_ref.shape, _NEG_BIG, jnp.float32)
        l_ref[...] = jnp.zeros(l_ref.shape, jnp.float32)
        acc_ref[...] = jnp.zeros(acc_ref.shape, jnp.float32)

    # Head-folded state: one load per buffer per grid step.
    m_all = m_ref[...]                                    # [TI, H]
    l_all = l_ref[...]                                    # [TI, H]
    acc_all = acc_ref[...]                                # [TI, H*D]

    # attention vector is shared across heads in GATv2; hoist the scalar reads.
    a_c1 = [c1 * attn_ref[0, d] for d in range(head_dim)]
    a_c2 = [c2 * attn_ref[0, d] for d in range(head_dim)]

    new_m, new_l, new_acc = [], [], []
    for h in range(n_heads):                              # static unroll (H small)
        lo = h * head_dim
        m_h = m_all[:, h:h + 1]                           # [TI, 1]
        l_h = l_all[:, h:h + 1]                           # [TI, 1]
        acc_h = acc_all[:, lo:lo + head_dim]              # [TI, D]

        gri_h = gri_ref[:, lo:lo + head_dim]              # [TI, D] destination feats
        glt_h = glt_ref[lo:lo + head_dim, :]              # [D, TJ] source feats (lanes)

        # Rank-1 (c1) part of the factored score: c1 * a.(g_l[j] + g_r[i]).
        sr_h = a_c1[0] * gri_h[:, 0:1]                    # [TI, 1]
        sl_h = a_c1[0] * glt_h[0:1, :]                    # [1, TJ]
        for d in range(1, head_dim):
            sr_h = sr_h + a_c1[d] * gri_h[:, d:d + 1]
            sl_h = sl_h + a_c1[d] * glt_h[d:d + 1, :]

        for c in range(n_chunks):                         # in-kernel j streaming
            cs = c * tile_c
            # e[i,j] = c1*(a.g_l[j] + a.g_r[i]) + c2*sum_d a_d*|g_l[j,d]+g_r[i,d]|
            e = sr_h + sl_h[:, cs:cs + tile_c]            # [TI, TC]
            for d in range(head_dim):
                u = gri_h[:, d:d + 1] + glt_h[d:d + 1, cs:cs + tile_c]
                e = e + a_c2[d] * jnp.abs(u)

            # int8 adjacency -> additive mask (finite => no NaN for padded rows).
            adj_f = adj_ref[:, cs:cs + tile_c].astype(jnp.float32)   # 0/1
            e = e + (adj_f - 1.0) * (-_NEG_BIG)

            # Online softmax over sources (torch Softmax(dim=1)).
            m_new = jnp.maximum(m_h, jnp.max(e, axis=1, keepdims=True))
            alpha = jnp.exp(m_h - m_new)
            p = jnp.exp(e - m_new)                        # [TI, TC]
            l_h = alpha * l_h + jnp.sum(p, axis=1, keepdims=True)
            acc_h = alpha * acc_h + jnp.dot(
                p, grj_ref[cs:cs + tile_c, lo:lo + head_dim],
                preferred_element_type=jnp.float32)
            m_h = m_new

        new_m.append(m_h)
        new_l.append(l_h)
        new_acc.append(acc_h)

    # Single head-folded write-back per grid step.
    m_ref[...] = jnp.concatenate(new_m, axis=1) if n_heads > 1 else new_m[0]
    l_ref[...] = jnp.concatenate(new_l, axis=1) if n_heads > 1 else new_l[0]
    acc_ref[...] = jnp.concatenate(new_acc, axis=1) if n_heads > 1 else new_acc[0]

    @pl.when(jblk == pl.num_programs(1) - 1)
    def _finalize():
        l_cat = jnp.concatenate(new_l, axis=1) if n_heads > 1 else new_l[0]
        inv_l = pl.reciprocal(l_cat, approx=True)         # EUP slot (free)
        outs = [new_acc[h] * inv_l[:, h:h + 1] for h in range(n_heads)]
        if is_concat:
            res = jnp.concatenate(outs, axis=1) if n_heads > 1 else outs[0]
        else:
            res = outs[0]
            for h in range(1, n_heads):
                res = res + outs[h]
            res = res * (1.0 / n_heads)                   # head mean
        # Lane-dense transposed store: [out_dim, TI] (nodes on the lane axis).
        out_ref[...] = res.T.astype(out_ref.dtype)


# ------------------------------- layer wrapper --------------------------------

def gatv2_layer(x_t, w_l, w_r, attn, adj_i8, *, is_concat, apply_elu,
                negative_slope=0.2, tile_i=128, tile_j=None, tile_c=128):
    """One GraphAttentionV2Layer.

    x_t: [F, N_pad] (transposed, zero-padded node features);
    w_l / w_r: [H, F, D] per-head linear weights (already W^T); attn: [1, D]
    (shared across heads in GATv2); adj_i8: [N_pad, N_pad] int8 0/1 mask.
    Returns the TRANSPOSED output: [H*D, N_pad] if is_concat else [D, N_pad].
    """
    n_heads, in_f, head_dim = w_l.shape
    hd = n_heads * head_dim
    n_pad = x_t.shape[1]
    if tile_j is None:
        tile_j = n_pad
    tile_c = min(tile_c, tile_j)
    assert x_t.shape[0] == in_f
    assert n_pad % tile_i == 0 and n_pad % tile_j == 0 and tile_j % tile_c == 0
    out_dim = hd if is_concat else head_dim

    # Pack per-head weights into lane-dense [F, H*D] (and the [H*D, F] transpose
    # used to emit g_l already transposed).  Host-side, outside the kernels.
    wr_p = jnp.transpose(w_r, (1, 0, 2)).reshape(in_f, hd)        # [F, H*D]
    wl_t = jnp.transpose(w_l, (1, 0, 2)).reshape(in_f, hd).T      # [H*D, F]

    # ---- 1) fused per-head projections (column-tiled over x^T, MXU) ----------
    g_lt, g_r = pl.pallas_call(
        functools.partial(_proj_kernel, apply_elu=apply_elu),
        out_shape=(jax.ShapeDtypeStruct((hd, n_pad), jnp.float32),
                   jax.ShapeDtypeStruct((n_pad, hd), jnp.float32)),
        grid_spec=pltpu.PrefetchScalarGridSpec(
            num_scalar_prefetch=0,
            grid=(n_pad // tile_i,),
            in_specs=[pl.BlockSpec((in_f, tile_i), lambda i: (0, i)),   # x^T
                      pl.BlockSpec((hd, in_f), lambda i: (0, 0)),       # W_l^T
                      pl.BlockSpec((in_f, hd), lambda i: (0, 0))],      # W_r
            out_specs=[pl.BlockSpec((hd, tile_i), lambda i: (0, i)),    # g_l^T
                       pl.BlockSpec((tile_i, hd), lambda i: (i, 0))]),  # g_r
        compiler_params=pltpu.CompilerParams(
            dimension_semantics=("parallel",),
            vmem_limit_bytes=_VMEM_LIMIT),
    )(x_t, wl_t, wr_p)

    # ---- 2) flash-style attention over (query tile, big source block) --------
    grid = (n_pad // tile_i, n_pad // tile_j)
    out_t = pl.pallas_call(
        functools.partial(_attn_kernel, n_heads=n_heads, head_dim=head_dim,
                          is_concat=is_concat, negative_slope=negative_slope,
                          tile_c=tile_c),
        out_shape=jax.ShapeDtypeStruct((out_dim, n_pad), jnp.float32),
        grid_spec=pltpu.PrefetchScalarGridSpec(
            num_scalar_prefetch=0,
            grid=grid,
            in_specs=[pl.BlockSpec((hd, tile_j), lambda i, j: (0, j)),      # g_l^T (src)
                      pl.BlockSpec((tile_i, hd), lambda i, j: (i, 0)),      # g_r (dst)
                      pl.BlockSpec((tile_j, hd), lambda i, j: (j, 0)),      # g_r (src)
                      pl.BlockSpec((tile_i, tile_j), lambda i, j: (i, j)),  # adj int8
                      pl.BlockSpec(memory_space=pltpu.MemorySpace.SMEM)],   # attn vec
            out_specs=pl.BlockSpec((out_dim, tile_i), lambda i, j: (0, i)),
            scratch_shapes=[pltpu.VMEM((tile_i, n_heads), jnp.float32),     # m (lane-folded)
                            pltpu.VMEM((tile_i, n_heads), jnp.float32),     # l
                            pltpu.VMEM((tile_i, hd), jnp.float32)]),        # acc
        compiler_params=pltpu.CompilerParams(
            dimension_semantics=("parallel", "arbitrary"),
            vmem_limit_bytes=_VMEM_LIMIT),
    )(g_lt, g_r, g_r, adj_i8, attn)

    return out_t


# ---------------- parameter init (deterministic, torch nn.Linear-like) -------------

def _linear_weight(key, fan_in, shape):
    bound = 1.0 / (fan_in ** 0.5)
    return jax.random.uniform(key, shape, jnp.float32, -bound, bound)


def init_gat_params(key, in_features, out_features, n_hidden, n_heads,
                    share_weights=False):
    d1 = n_hidden // n_heads                     # layer1 per-head hidden (is_concat)
    ks = jax.random.split(key, 6)
    w1_l = _linear_weight(ks[0], in_features, (n_heads, in_features, d1))
    w1_r = w1_l if share_weights else _linear_weight(ks[1], in_features,
                                                     (n_heads, in_features, d1))
    a1 = _linear_weight(ks[2], d1, (1, d1))
    w2_l = _linear_weight(ks[3], n_hidden, (1, n_hidden, out_features))
    w2_r = w2_l if share_weights else _linear_weight(ks[4], n_hidden,
                                                     (1, n_hidden, out_features))
    a2 = _linear_weight(ks[5], out_features, (1, out_features))
    return dict(w1_l=w1_l, w1_r=w1_r, a1=a1, w2_l=w2_l, w2_r=w2_r, a2=a2)


# ---------------- full GAT forward (dropout = identity / eval mode) ----------------

def gat_forward(params, x, adj_mat, n_heads, *, tile_i=128, tj_cap=1024, tile_c=128):
    del n_heads  # head count comes from the packed weights
    assert adj_mat.shape[2] == 1, "per-head adjacency not supported"  # TODO(synk)
    assert tj_cap % tile_i == 0 and tile_c % 128 == 0

    n, in_f = x.shape
    n_pad = _round_up(n, tile_i)
    if n_pad <= tj_cap:
        tile_j = n_pad                      # whole graph as one source block
    else:
        tile_j = tj_cap
        n_pad = _round_up(n_pad, tile_j)

    # int8 adjacency (4x less HBM than f32), padded once, shared by both layers.
    adj_i8 = jnp.zeros((n_pad, n_pad), jnp.int8).at[:n, :n].set(
        (adj_mat[:, :, 0] != 0).astype(jnp.int8))
    # transposed, zero-padded node features (the layout both layers consume)
    x_t = jnp.zeros((in_f, n_pad), jnp.float32).at[:, :n].set(
        x.T.astype(jnp.float32))

    h_t = gatv2_layer(x_t, params["w1_l"], params["w1_r"], params["a1"], adj_i8,
                      is_concat=True, apply_elu=False,
                      tile_i=tile_i, tile_j=tile_j, tile_c=tile_c)
    out_t = gatv2_layer(h_t, params["w2_l"], params["w2_r"], params["a2"], adj_i8,
                        is_concat=False, apply_elu=True,      # ELU fused here
                        tile_i=tile_i, tile_j=tile_j, tile_c=tile_c)
    return out_t[:, :n].T                                     # [n, out_features]


# ---------------- pure-JAX reference (same math, no Pallas) ------------------------

def _gatv2_layer_ref(x, w_l, w_r, attn, adj_hnn, is_concat, apply_elu, neg=0.2):
    if apply_elu:
        x = jnp.where(x > 0.0, x, jnp.exp(x) - 1.0)
    g_l = jnp.einsum("nf,hfd->nhd", x, w_l)
    g_r = jnp.einsum("nf,hfd->nhd", x, w_r)
    g_sum = g_l[None, :, :, :] + g_r[:, None, :, :]          # [i, j, h, d]
    act = jnp.where(g_sum >= 0.0, g_sum, neg * g_sum)
    e = jnp.einsum("ijhd,d->ijh", act, attn[0])
    adj = jnp.transpose(adj_hnn, (1, 2, 0))                  # [N, N, H]
    e = jnp.where(adj == 0.0, -jnp.inf, e)
    a = jax.nn.softmax(e, axis=1)
    out = jnp.einsum("ijh,jhd->ihd", a, g_r)
    n, hh, dd = out.shape
    return out.reshape(n, hh * dd) if is_concat else out.mean(axis=1)


def gat_forward_ref(params, x, adj_mat, n_heads):
    n_nodes = x.shape[0]
    adj = jnp.transpose(adj_mat.astype(jnp.float32), (2, 0, 1))
    adj1 = jnp.broadcast_to(adj, (n_heads, n_nodes, n_nodes)) if adj.shape[0] == 1 else adj
    h = _gatv2_layer_ref(x, params["w1_l"], params["w1_r"], params["a1"], adj1,
                         is_concat=True, apply_elu=False)
    return _gatv2_layer_ref(h, params["w2_l"], params["w2_r"], params["a2"], adj[:1],
                            is_concat=False, apply_elu=True)


if __name__ == "__main__":
    # 400 nodes pads to 512; with tj_cap=256 the attention grid is (4, 2) with
    # two in-kernel chunks per source block: this exercises the megacore-parallel
    # query axis, the streamed (cross-grid-step) online softmax AND the in-kernel
    # chunk loop.  Production default keeps tj_cap=1024 (whole graph per step).
    n_nodes, in_features, n_hidden, n_heads, out_features = 400, 8, 16, 4, 4

    key = jax.random.PRNGKey(0)
    k_x, k_adj, k_p = jax.random.split(key, 3)

    x = jax.random.normal(k_x, (n_nodes, in_features), jnp.float32)
    # adjacency [N, N, 1] with self-loops (so every softmax row has a valid entry)
    rand_adj = (jax.random.uniform(k_adj, (n_nodes, n_nodes)) < 0.15).astype(jnp.float32)
    adj_mat = jnp.maximum(rand_adj, jnp.eye(n_nodes, dtype=jnp.float32))[:, :, None]

    params = init_gat_params(k_p, in_features, out_features, n_hidden, n_heads,
                             share_weights=False)

    out = jax.block_until_ready(gat_forward(params, x, adj_mat, n_heads, tj_cap=256))
    ref = jax.block_until_ready(gat_forward_ref(params, x, adj_mat, n_heads))

    assert out.shape == (n_nodes, out_features), out.shape
    err = float(jnp.max(jnp.abs(out - ref)))
    assert jnp.allclose(out, ref, atol=2e-3, rtol=2e-3), err

    print("KERNEL_OK")
</pallas_src>

<mosaic_0001>
module attributes {stable_mosaic.version = 11 : i64} {
  func.func @_proj_kernel(%arg0: i32, %arg1: memref<8x128xf32, #tpu.memory_space<vmem>>, %arg2: memref<16x8xf32, #tpu.memory_space<vmem>>, %arg3: memref<8x16xf32, #tpu.memory_space<vmem>>, %arg4: memref<16x128xf32, #tpu.memory_space<vmem>>, %arg5: memref<128x16xf32, #tpu.memory_space<vmem>>) attributes {dimension_semantics = [#tpu.dimension_semantics<parallel>], iteration_bounds = array<i64: 4>, scalar_prefetch = 0 : i64, scratch_operands = 0 : i64, tpu.core_type = #tpu.core_type<tc>, window_params = [{transform_indices = @transform_0, window_bounds = array<i64: 8, 128>}, {pipeline_mode = #tpu.pipeline_mode<synchronous>, transform_indices = @transform_1, window_bounds = array<i64: 16, 8>}, {pipeline_mode = #tpu.pipeline_mode<synchronous>, transform_indices = @transform_2, window_bounds = array<i64: 8, 16>}, {transform_indices = @transform_3, window_bounds = array<i64: 16, 128>}, {transform_indices = @transform_4, window_bounds = array<i64: 128, 16>}]} {
    %c0 = arith.constant 0 : index
    %c0_0 = arith.constant 0 : index
    %0 = vector.load %arg1[%c0, %c0_0] : memref<8x128xf32, #tpu.memory_space<vmem>>, vector<8x128xf32>
    %c0_1 = arith.constant 0 : index
    %c0_2 = arith.constant 0 : index
    %1 = vector.load %arg2[%c0_1, %c0_2] : memref<16x8xf32, #tpu.memory_space<vmem>>, vector<16x8xf32>
    %cst = arith.constant dense<0.000000e+00> : vector<16x128xf32>
    %2 = tpu.matmul %1, %0, %cst {dimension_numbers = #tpu.dot_dimension_numbers<[1], [0], [0], [1], [0, 0, 1, 1], [], []>} : vector<16x8xf32>, vector<8x128xf32>, vector<16x128xf32> -> vector<16x128xf32>
    %c0_3 = arith.constant 0 : index
    %c0_4 = arith.constant 0 : index
    %3 = vector.load %arg4[%c0_3, %c0_4] : memref<16x128xf32, #tpu.memory_space<vmem>>, vector<16x128xf32>
    tpu.vector_store %arg4[%c0_3, %c0_4], %2 {strides = array<i32>} : memref<16x128xf32, #tpu.memory_space<vmem>>, vector<16x128xf32>,
    %4 = tpu.transpose %0, [1, 0] : vector<8x128xf32> -> vector<128x8xf32>
    %c0_5 = arith.constant 0 : index
    %c0_6 = arith.constant 0 : index
    %5 = vector.load %arg3[%c0_5, %c0_6] : memref<8x16xf32, #tpu.memory_space<vmem>>, vector<8x16xf32>
    %cst_7 = arith.constant dense<0.000000e+00> : vector<128x16xf32>
    %6 = tpu.matmul %4, %5, %cst_7 {dimension_numbers = #tpu.dot_dimension_numbers<[1], [0], [0], [1], [0, 0, 1, 1], [], []>} : vector<128x8xf32>, vector<8x16xf32>, vector<128x16xf32> -> vector<128x16xf32>
    %c0_8 = arith.constant 0 : index
    %c0_9 = arith.constant 0 : index
    %7 = vector.load %arg5[%c0_8, %c0_9] : memref<128x16xf32, #tpu.memory_space<vmem>>, vector<128x16xf32>
    tpu.vector_store %arg5[%c0_8, %c0_9], %6 {strides = array<i32>} : memref<128x16xf32, #tpu.memory_space<vmem>>, vector<128x16xf32>,
    return
  }
  func.func @transform_0(%arg0: i32) -> (i32, i32) {
    %c0_i32 = arith.constant 0 : i32
    %c0_i32_0 = arith.constant 0 : i32
    return %c0_i32, %arg0 : i32, i32
  }
  func.func @transform_1(%arg0: i32) -> (i32, i32) {
    %c0_i32 = arith.constant 0 : i32
    %c0_i32_0 = arith.constant 0 : i32
    %c0_i32_1 = arith.constant 0 : i32
    return %c0_i32, %c0_i32_0 : i32, i32
  }
  func.func @transform_2(%arg0: i32) -> (i32, i32) {
    %c0_i32 = arith.constant 0 : i32
    %c0_i32_0 = arith.constant 0 : i32
    %c0_i32_1 = arith.constant 0 : i32
    return %c0_i32, %c0_i32_0 : i32, i32
  }
  func.func @transform_3(%arg0: i32) -> (i32, i32) {
    %c0_i32 = arith.constant 0 : i32
    %c0_i32_0 = arith.constant 0 : i32
    return %c0_i32, %arg0 : i32, i32
  }
  func.func @transform_4(%arg0: i32) -> (i32, i32) {
    %c0_i32 = arith.constant 0 : i32
    %c0_i32_0 = arith.constant 0 : i32
    return %arg0, %c0_i32 : i32, i32
  }
}

</mosaic_0001>

<bundles_post_ra>
// kernel: tpu_custom_call.1
= control target key start
LH: loop header
LB: loop body
LE: loop exit
PB: predicated region body
PF: predicated region fallthrough
CT: control target
= control target key end

     0   :  { %10 = vsyncpa [#allocation3], 0  ;;  %s1167_s0 = inlined_call_operand.hbm [shape: f32[8,512], index: 0, kind: input, shape index: {}]   ;;  %s1168_s1 = inlined_call_operand.vmem [shape: f32[16,8], index: 1, kind: input, shape index: {}]   ;;  %s1169_s2 = inlined_call_operand.vmem [shape: f32[8,16], index: 2, kind: input, shape index: {}]   ;;  %s1170_s3 = inlined_call_operand.hbm [shape: f32[16,512], index: 3, kind: output, shape index: {0}]   ;;  %s1171_s4 = inlined_call_operand.vmem [shape: f32[512,16], index: 4, kind: output, shape index: {1}]  }
   0x1   :  { %12 = vsyncpa [#allocation3 + $0x1], 0 }
   0x2   :  { %13 = vsyncpa [#allocation4], 0 }
   0x3   :  { %15 = vsyncpa [#allocation4 + $0x1], 0  ;;  %s940_s15 = smov 0   ;;  %s942_s16 = smov 0  }
   0x4   :  { %s944_s17 = smov 0   ;;  %s946_s18 = smov 0  }
   0x5 LB: > { %s961_s19 = sadd.s32 4294967295, %s908_s18   ;;  %s677_s20 = sadd.s32 4294967294, %s908_s18   ;;  %s908_s18 = sphi %s946_s18, %s1185_s18   ;;  %s904_s17 = sphi %s944_s17, %s1184_s17   ;;  %s900_s16 = sphi %s942_s16, %s1183_s16   ;;  %s896_s15 = sphi %s940_s15, %s1182_s15  }
   0x6   : > { %s965_s21 = sadd.s32 1, %s908_s18   ;;  %s28_s22 = sadd.s32 1, %s904_s17 }
   0x7   : > { %s25_s23 = ssub.s32 %s908_s18, %s965_s21  ;;  %p35_p0 = scmp.ne.s32.totalorder %s904_s17, %s900_s16 }
   0x8   : > { %p26_p1 = scmp.eq.s32.totalorder %s25_s23, 0  ;;  %p36_p2 = scmp.eq.s32.totalorder %s908_s18, 0 }
   0x9   : > { %p41_p3 = scmp.ne.s32.totalorder %s900_s16, %s896_s15  ;;  %p42_p4 = scmp.eq.s32.totalorder %s961_s19, 0 }
   0xa   : > { %s977_s24 = scalar_select %p26_p1, %s904_s17, %s28_s22  }
   0xb   : > { %p979_p5 = por %p36_p2, %p35_p0  ;;  %p983_p6 = por %p42_p4, %p41_p3 }
   0xc   : > { %p107_p7 = scmp.eq.s32.totalorder %s961_s19, 3  ;;  %p113_p8 = scmp.eq.s32.totalorder %s677_s20, 3 }
   0xd   : > { %p774_p9 = scmp.lt.s32.totalorder %s908_s18, 4  ;;  %s165_s29 = sand.u32 1, %s904_s17  }
   0xe   : > { %p989_p10 = por %p107_p7, %p35_p0  ;;  %p993_p11 = por %p113_p8, %p41_p3 }
   0xf   : > { %s681_s30 = sshll.u32 %s908_s18, 7  ;;  %s680_s5 = sshll.u32 %s165_s29, 3 }
  0x10   : > { %s1175_s27 = scalar_select %p989_p10, 1, 0 }
  0x11   : > { %s1176_s28 = scalar_select %p993_p11, 1, 0 }
  0x12   : > { %s1002_s8 = scalar_lea.hbm %s1167_s0, %s681_s30  ;;  %s169_s9 = scalar_lea.vmem [#allocation2], %s680_s5 }
  0x13   : > { %s176_s10 = sshll.u32 %s169_s9, 4  ;;  %p1006_p12 = pnand %p774_p9, %p979_p5  ;;  %s1010_s10 = int_to_ptr.vmem [resolvable:$true] %s176_s10 }
  0x14   : > { %s166_s12 = scalar_lea.sflag [#allocation3], %s165_s29  ;;  %s812_s13 = scalar_lea.hbm %s1002_s8, 128 }
  0x15   : > { %p813_p1 = scmp.ne.s32.totalorder %s1002_s8, %s812_s13  ;;  %p814_p2 = pneg %p1006_p12 }
  0x16   : > { %s817_s22 = scalar_lea.hbm %s1167_s0, 512  ;;  %p818_p5 = scmp.lt.u32.totalorder %s1002_s8, %s1167_s0 }
  0x17   : > { %p815_p3 = pnand %p814_p2, %p813_p1  ;;  %p819_p7 = scmp.lt.u32.totalorder %s817_s22, %s812_s13 }
  0x18   : > { %p821_p9 = scmp.lt.u32.totalorder %s812_s13, %s1002_s8 }
  0x19   : > { %p816_p4 = pneg %p815_p3  ;;  %p820_p8 = por %p819_p7, %p818_p5 }
  0x1b   : > { %p822_p13 = por %p821_p9, %p820_p8 }
  0x1d   : > { %p823_p0 = pnand %p822_p13, %p816_p4 }
  0x1f   : > { %826 = shalt.err (!%p823_p0)
}
  0x20   : > { %s827_s29 = scalar_lea.vmem %s1010_s10, 128  ;;  %s910_s30 = smov [#allocation2]  }
  0x21   : > { %p828_p1 = scmp.ne.s32.totalorder %s1010_s10, %s827_s29  ;;  %s832_s5 = sshll.u32 %s910_s30, 4  ;;  %s833_s5 = int_to_ptr.vmem [resolvable:$false] %s832_s5 }
  0x22   : > { %s834_s6 = scalar_lea.vmem %s833_s5, 256  ;;  %p835_p10 = scmp.lt.s32.totalorder %s1010_s10, %s833_s5 }
  0x23   : > { %p830_p3 = pnand %p828_p1, %p814_p2  ;;  %p836_p5 = scmp.lt.s32.totalorder %s834_s6, %s827_s29 }
  0x25   : > { %p831_p11 = pneg %p830_p3  ;;  %p837_p7 = por %p836_p5, %p835_p10 }
  0x27   : > { %p838_p8 = pnand %p837_p7, %p831_p11 }
  0x29   : > { %841 = shalt.err (!%p838_p8)
}
  0x2a   : > { %769 = dma.hbm_to_vmem [thread:$0]  (!%p1006_p12), %s1002_s8, 128, %s1010_s10, %s166_s12  }
  0x2b   : > { %p1178_p13 = scmp.lt.s32.totalorder %s908_s18, 5  ;;  %p1179_p0 = scmp.ge.s32.totalorder %s908_s18, 1 }
  0x2d   : > { %p182_p2 = pnand %p1179_p0, %p1178_p13 }
  0x2e   : > { %s1044_s7 = sand.u32 (!%p182_p2), 1, %s900_s16  }
  0x2f   : > { %185 = sbr.rel (%p182_p2) target bundleno = 459 (0x1cb), region = 32  ;;  %s683_s9 = sshll.u32 (!%p182_p2), %s1044_s7, 3 }
  0x30   : > { %s188_s13 = scalar_lea.sflag (!%p182_p2), [#allocation3], %s1044_s7  ;;  %s191_s14 = scalar_lea.vmem (!%p182_p2), [#allocation2], %s683_s9 }
  0x36   : > { %887 = dma.done.wait (%p983_p6), %s188_s13, 128  }
  0x37   : > { %889 = vsyncadd (%p983_p6), %s188_s13, 4294967168  ;;  %vm230_vm0 = vcmask 64512   ;;  %v227_v0 = vld [vmem:[%s191_s14] sm:$0xff]  ;;  %s684_s26 = sshll.u32 %s1044_s7, 4  ;;  %s706_s29 = sshll.u32 %s961_s19, 7 }
  0x38   : > { %v228_v1 = vld [vmem:[%s1168_s1] sm:$0xff]  ;;  %v229_v2 = vld [vmem:[%s1168_s1 + $0x8] sm:$0xff]  ;;  %314 = vxpose.xlu0.b32.start.end [1/1] (short) %v227_v0, 128  ;;  %729 = vmatprep.subr.mxu0 %v227_v0  ;;  %s213_s23 = scalar_lea.vmem [#allocation5], %s684_s26  ;;  %s1086_s6 = scalar_lea.hbm %s1170_s3, %s706_s29 }
  0x39   : > { %730 = vmatpush3.msra.mxu0 %v227_v0  ;;  %731 = vmatprep.mubr.msk.f32.mxu0 %vm230_vm0, %v228_v1  ;;  %v346_v3 = vld [vmem:[%s1169_s2] sm:$0xff]  ;;  %s575_s25 = sshll.u32 %s213_s23, 4  ;;  %s558_s9 = scalar_lea.sflag [#allocation4], %s1044_s7  ;;  %s1080_s25 = int_to_ptr.vmem [resolvable:$true] %s575_s25 }
  0x3a   : > { %732 = vmatmul.mubr.msk.f32.vlgmr.msra.gmra.mrb[0].mxu0 %vm230_vm0, %v229_v2  ;;  %734 = vmatprep.subr.mxu0 %v346_v3  ;;  %s842_s13 = scalar_lea.vmem %s1080_s25, 256  ;;  %p1180_p10 = scmp.ne.s32.totalorder %s1175_s27, 0 }
  0x3b   : > { %735 = vmatpush3.msra.mxu0 %v346_v3  ;;  %760 = vmatprep.subr.mxu1 %v346_v3  ;;  %p843_p6 = scmp.ne.s32.totalorder %s1080_s25, %s842_s13  ;;  %s911_s14 = smov [#allocation5]  }
  0x3c   : > { %761 = vmatpush3.msra.mxu1 %v346_v3  ;;  %s846_s8 = sshll.u32 %s911_s14, 4  ;;  %s847_s8 = int_to_ptr.vmem [resolvable:$false] %s846_s8 }
  0x3d   : > { %p844_p11 = pnand %p843_p6, %p1180_p10  ;;  %s848_s10 = scalar_lea.vmem %s847_s8, 512 }
  0x3e   : > { %p849_p4 = scmp.lt.s32.totalorder %s1080_s25, %s847_s8  ;;  %p850_p9 = scmp.lt.s32.totalorder %s848_s10, %s842_s13 }
  0x3f   : > { %p845_p12 = pneg %p844_p11 }
  0x40   : > { %p851_p1 = por %p850_p9, %p849_p4 }
  0x42   : > { %p852_p3 = pnand %p851_p1, %p845_p12 }
  0xb8   : > { %v330_v4 = vpop.trf.xlu0 }
  0xb9   : > { %736 = vmatprep.mubr.msk.f32.mxu0 %vm230_vm0, %v330_v4 }
  0xbc   : > { %v331_v5 = vpop.trf.xlu0 }
  0xbd   : > { %737 = vmatmul.mubr.msk.f32.vlgmr.msra.gmra.mrb[2].mxu0 %vm230_vm0, %v331_v5 }
  0xc0   : > { %v332_v6 = vpop.trf.xlu0 }
  0xc1   : > { %739 = vmatprep.mubr.msk.f32.mxu0 %vm230_vm0, %v332_v6 }
  0xc4   : > { %v333_v7 = vpop.trf.xlu0 }
  0xc5   : > { %740 = vmatmul.mubr.msk.f32.gmra.mrb[4].mxu0 %vm230_vm0, %v333_v7 }
  0xc8   : > { %v334_v8 = vpop.trf.xlu0 }
  0xc9   : > { %742 = vmatprep.mubr.msk.f32.mxu0 %vm230_vm0, %v334_v8 }
  0xcc   : > { %v335_v9 = vpop.trf.xlu0 }
  0xcd   : > { %743 = vmatmul.mubr.msk.f32.gmra.mrb[6].mxu0 %vm230_vm0, %v335_v9 }
  0xd0   : > { %v336_v10 = vpop.trf.xlu0 }
  0xd1   : > { %745 = vmatprep.mubr.msk.f32.mxu1 %vm230_vm0, %v336_v10 }
  0xd4   : > { %v337_v11 = vpop.trf.xlu0 }
  0xd5   : > { %746 = vmatmul.mubr.msk.f32.vlgmr.msra.gmra.mrb[0].mxu1 %vm230_vm0, %v337_v11 }
  0xd8   : > { %v338_v12 = vpop.trf.xlu0 }
  0xd9   : > { %748 = vmatprep.mubr.msk.f32.mxu1 %vm230_vm0, %v338_v12 }
  0xdc   : > { %v339_v13 = vpop.trf.xlu0 }
  0xdd   : > { %749 = vmatmul.mubr.msk.f32.gmra.mrb[2].mxu1 %vm230_vm0, %v339_v13 }
  0xe0   : > { %v340_v14 = vpop.trf.xlu0 }
  0xe1   : > { %751 = vmatprep.mubr.msk.f32.mxu1 %vm230_vm0, %v340_v14 }
  0xe4   : > { %v341_v15 = vpop.trf.xlu0 }
  0xe5   : > { %752 = vmatmul.mubr.msk.f32.gmra.mrb[4].mxu1 %vm230_vm0, %v341_v15 }
  0xe8   : > { %v342_v16 = vpop.trf.xlu0 }
  0xe9   : > { %754 = vmatprep.mubr.msk.f32.mxu1 %vm230_vm0, %v342_v16 }
  0xec   : > { %v343_v17 = vpop.trf.xlu0 }
  0xed   : > { %755 = vmatmul.mubr.msk.f32.gmra.mrb[6].mxu1 %vm230_vm0, %v343_v17 }
  0xf0   : > { %v344_v18 = vpop.trf.xlu0 }
  0xf1   : > { %757 = vmatprep.mubr.msk.f32.mxu1 %vm230_vm0, %v344_v18 }
  0xf4   : > { %v345_v19 = vpop.trf.xlu0 }
  0xf5   : > { %758 = vmatmul.mubr.msk.f32.gmra.mrb[8].mxu1 %vm230_vm0, %v345_v19 }
 0x10d   : > { %v733_v20 = vpop.f32.mrb[0].mxu0 }
 0x10e   : > { %313 = vst [vmem:[%s213_s23 + $0x8] sm:$0xff] %v733_v20  ;;  %v303_v21 = vpop.f32.mrb[1].mxu0 }
 0x10f   : > { %312 = vst [vmem:[%s213_s23] sm:$0xff] %v303_v21 }
 0x110   : > { %855 = shalt.err (!%p852_p3)
}
 0x111   : > { %s856_s11 = scalar_lea.hbm %s1086_s6, 256  ;;  %s860_s22 = scalar_lea.hbm %s1170_s3, 1024 }
 0x112   : > { %p857_p5 = scmp.ne.s32.totalorder %s1086_s6, %s856_s11  ;;  %p861_p13 = scmp.lt.u32.totalorder %s1086_s6, %s1170_s3 }
 0x113   : > { %p862_p0 = scmp.lt.u32.totalorder %s860_s22, %s856_s11  ;;  %p864_p6 = scmp.lt.u32.totalorder %s856_s11, %s1086_s6 }
 0x114   : > { %p858_p7 = pnand %p857_p5, %p1180_p10 }
 0x115   : > { %p863_p2 = por %p862_p0, %p861_p13 }
 0x116   : > { %p859_p8 = pneg %p858_p7 }
 0x117   : > { %p865_p11 = por %p864_p6, %p863_p2 }
 0x119   : > { %p866_p12 = pnand %p865_p11, %p859_p8 }
 0x11b   : > { %869 = shalt.err (!%p866_p12)
}
 0x11c   : > { %s912_s29 = smov 128   ;;  %s913_s30 = smov 512   ;;  %vm540_vm1 = vcmask 130048  }
 0x11d   : > { %s914_s5 = smov 8   ;;  %s685_s13 = sshll.u32 %s961_s19, 4 }
 0x11e   : > { %764 = dma.vmem_to_hbm [thread:$0]  (%p1180_p10), %s1080_s25, 256, %s1086_s6, %s558_s9, %s912_s29, %s913_s30, %s914_s5  }
 0x11f   : > { %p222_p4 = scmp.lt.s32.totalorder %s685_s13, 63 }
 0x121   : > { %s1187_s13 = smov (!%p222_p4, %s685_s13), 63 }
 0x122   : > { %s686_s14 = sshll.u32 %s1187_s13, 3 }
 0x123   : > { %s1116_s11 = scalar_lea.vmem %s1171_s4, %s686_s14 }
 0x190   : > { %v738_v22 = vpop.f32.mrb[2].mxu0 }
 0x191   : > { %542 = vst.msk [vmem:[%s1116_s11 + $0x8] sm:$0xff] %vm540_vm1, %v738_v22  ;;  %v461_v23 = vpop.f32.mrb[3].mxu0 }
 0x192   : > { %541 = vst.msk [vmem:[%s1116_s11] sm:$0xff] %vm540_vm1, %v461_v23 }
 0x198   : > { %v741_v24 = vpop.f32.mrb[4].mxu0 }
 0x199   : > { %544 = vst.msk [vmem:[%s1116_s11 + $0x18] sm:$0xff] %vm540_vm1, %v741_v24  ;;  %v471_v25 = vpop.f32.mrb[5].mxu0 }
 0x19a   : > { %543 = vst.msk [vmem:[%s1116_s11 + $0x10] sm:$0xff] %vm540_vm1, %v471_v25 }
 0x1a0   : > { %v744_v26 = vpop.f32.mrb[6].mxu0 }
 0x1a1   : > { %546 = vst.msk [vmem:[%s1116_s11 + $0x28] sm:$0xff] %vm540_vm1, %v744_v26  ;;  %v481_v27 = vpop.f32.mrb[7].mxu0 }
 0x1a2   : > { %545 = vst.msk [vmem:[%s1116_s11 + $0x20] sm:$0xff] %vm540_vm1, %v481_v27 }
 0x1a8   : > { %v747_v28 = vpop.f32.mrb[0].mxu1 }
 0x1a9   : > { %548 = vst.msk [vmem:[%s1116_s11 + $0x38] sm:$0xff] %vm540_vm1, %v747_v28  ;;  %v491_v29 = vpop.f32.mrb[1].mxu1 }
 0x1aa   : > { %547 = vst.msk [vmem:[%s1116_s11 + $0x30] sm:$0xff] %vm540_vm1, %v491_v29 }
 0x1b0   : > { %v750_v30 = vpop.f32.mrb[2].mxu1 }
 0x1b1   : > { %550 = vst.msk [vmem:[%s1116_s11 + $0x48] sm:$0xff] %vm540_vm1, %v750_v30  ;;  %v501_v31 = vpop.f32.mrb[3].mxu1 }
 0x1b2   : > { %549 = vst.msk [vmem:[%s1116_s11 + $0x40] sm:$0xff] %vm540_vm1, %v501_v31 }
 0x1b8   : > { %v753_v32 = vpop.f32.mrb[4].mxu1 }
 0x1b9   : > { %552 = vst.msk [vmem:[%s1116_s11 + $0x58] sm:$0xff] %vm540_vm1, %v753_v32  ;;  %v511_v33 = vpop.f32.mrb[5].mxu1 }
 0x1ba   : > { %551 = vst.msk [vmem:[%s1116_s11 + $0x50] sm:$0xff] %vm540_vm1, %v511_v33 }
 0x1c0   : > { %v756_v34 = vpop.f32.mrb[6].mxu1 }
 0x1c1   : > { %554 = vst.msk [vmem:[%s1116_s11 + $0x68] sm:$0xff] %vm540_vm1, %v756_v34  ;;  %v521_v35 = vpop.f32.mrb[7].mxu1 }
 0x1c2   : > { %553 = vst.msk [vmem:[%s1116_s11 + $0x60] sm:$0xff] %vm540_vm1, %v521_v35 }
 0x1c8   : > { %v759_v36 = vpop.f32.mrb[8].mxu1 }
 0x1c9   : > { %556 = vst.msk [vmem:[%s1116_s11 + $0x78] sm:$0xff] %vm540_vm1, %v759_v36  ;;  %v531_v37 = vpop.f32.mrb[9].mxu1 }
 0x1ca   : > { %555 = vst.msk [vmem:[%s1116_s11 + $0x70] sm:$0xff] %vm540_vm1, %v531_v37 }
 0x1cb PF: > { %p775_p10 = scmp.ge.s32.totalorder %s908_s18, 2  ;;  %s594_s19 = sand.u32 1, %s896_s15  }
 0x1cc   : > { %p1181_p9 = scmp.ne.s32.totalorder %s1176_s28, 0  ;;  %s595_s27 = scalar_lea.sflag [#allocation4], %s594_s19 }
 0x1ce   : > { %p771_p1 = pnand %p775_p10, %p1181_p9 }
 0x1d0   : > { %891 = dma.done.wait (!%p771_p1), %s595_s27, 256  }
 0x1d1   : > { %893 = vsyncadd (!%p771_p1), %s595_s27, 4294967040  ;;  %p18_p3 = scmp.ge.s32.totalorder %s965_s21, 6   ;;  %s1182_s15 = smov %s900_s16 }
 0x1d2   : > { %s1183_s16 = smov %s904_s17  ;;  %s1184_s17 = smov %s977_s24 }
 0x1d3   : > { %s1185_s18 = smov %s965_s21  ;;  %20 = sbr.rel (!%p18_p3) target bundleno = 5 (0x5), region = 89 }
 0x1da   :  { %608 = vsyncpa [#allocation3], 1 }
 0x1db   :  { %610 = vsyncpa [#allocation3 + $0x1], 1 }
 0x1dc   :  { %611 = vsyncpa [#allocation4], 1 }
 0x1dd   :  { %613 = vsyncpa [#allocation4 + $0x1], 1 }

</bundles_post_ra>
